<compile_context>
chip_gen: v5e
topology: v5e:2x2
jax: 0.10.0
libtpu: 0.0.40
codegen_flags: <defaults>
</compile_context>

<pallas_src>
import functools

import jax
import jax.numpy as jnp
from jax.experimental import pallas as pl
from jax.experimental.pallas import tpu as pltpu

_LANE = 128      # vreg lane width    -> feature dims padded to 128-multiples
_SUBLANE = 8     # vreg sublane width -> batch dim padded to 8-multiples
_MIB = 1024 * 1024


def _round_up(x, m):
    return ((x + m - 1) // m) * m


def _cdiv(a, b):
    return (a + b - 1) // b


def _pick_tile(dim, candidates):
    """Largest candidate that divides `dim` (dim already lane/sublane padded)."""
    for c in candidates:
        if c <= dim and dim % c == 0:
            return c
    return dim


def _vmem_capacity_bytes():
    """Physical VMEM per TensorCore (128 MiB v5e/v6e, 64 MiB v7x)."""
    try:
        info = pltpu.get_tpu_info()
        cap = getattr(info, "vmem_capacity_bytes", None)
        if cap:
            return int(cap)
    except Exception:
        pass
    return 64 * _MIB  # conservative fallback (v7x-sized) -> safe everywhere


def _block_spec(shape, index_map, buffers=None):
    """BlockSpec with optional explicit buffer count (single-buffered resident
    weights; deeper pipeline for tiny LHS). Falls back if this jax build's
    BlockSpec lacks pipeline_mode."""
    if buffers is None:
        return pl.BlockSpec(shape, index_map)
    try:
        return pl.BlockSpec(shape, index_map,
                            pipeline_mode=pl.Buffered(buffer_count=buffers))
    except (TypeError, AttributeError):
        return pl.BlockSpec(shape, index_map)


# ---------------------------------------------------------------------------
# Fused whole-MLP kernel (weights resident in VMEM, grid over batch tiles)
# ---------------------------------------------------------------------------
def _fused_mlp_kernel(*refs, num_layers, activations, compute_dtype):
    # refs = (x, w0, b0, w1, b1, ..., w_{L-1}, b_{L-1}, out)
    x_ref = refs[0]
    o_ref = refs[-1]
    h = x_ref[...]                                       # (tm, K0p)
    for l in range(num_layers):
        w = refs[1 + 2 * l][...]                         # (Klp, Nlp)
        b = refs[2 + 2 * l][...]                         # (1,   Nlp)
        y = jnp.dot(h, w, preferred_element_type=jnp.float32)
        y = y + b.astype(jnp.float32)
        act = activations[l]
        if act == "relu":
            y = jnp.maximum(y, 0.0)
        elif act == "sigmoid":
            y = jax.nn.sigmoid(y)
        # f32 epilogue; intermediates cast back to the WEIGHT dtype so the
        # next matmul stays on the homogeneous (bf16-capable) MXU path.
        h = y if l == num_layers - 1 else y.astype(compute_dtype)
    o_ref[...] = h.astype(o_ref.dtype)


def _fused_mlp_call(x_p, weights_biases, activations, out_dtype, tm, vmem_limit):
    Mp, K0p = x_p.shape
    NLp = weights_biases[-1][0].shape[1]
    compute_dtype = weights_biases[0][0].dtype

    in_specs = [pl.BlockSpec((tm, K0p), lambda i: (i, 0))]
    operands = [x_p]
    for (w, b) in weights_biases:
        Kp, Np = w.shape
        # Grid-invariant -> single-buffered residents (halve their VMEM cost).
        in_specs.append(_block_spec((Kp, Np), lambda i: (0, 0), buffers=1))
        in_specs.append(_block_spec((1, Np), lambda i: (0, 0), buffers=1))
        operands.extend([w, b])

    kernel = functools.partial(
        _fused_mlp_kernel,
        num_layers=len(weights_biases),
        activations=tuple(activations),
        compute_dtype=compute_dtype,
    )
    return pl.pallas_call(
        kernel,
        out_shape=jax.ShapeDtypeStruct((Mp, NLp), out_dtype),
        grid=(Mp // tm,),
        in_specs=in_specs,
        out_specs=pl.BlockSpec((tm, NLp), lambda i: (i, 0)),
        compiler_params=pltpu.CompilerParams(
            dimension_semantics=("parallel",),
            vmem_limit_bytes=int(vmem_limit)),
    )(*operands)


# ---------------------------------------------------------------------------
# Tiled single-layer kernel (fallback for layers too big to keep resident)
# ---------------------------------------------------------------------------
def _linear_tiled_kernel(x_ref, w_ref, b_ref, o_ref, acc_ref, *, activation):
    k = pl.program_id(2)

    @pl.when(k == 0)
    def _():
        acc_ref[...] = jnp.zeros_like(acc_ref)

    acc_ref[...] += jnp.dot(x_ref[...], w_ref[...],
                            preferred_element_type=jnp.float32)

    @pl.when(k == pl.num_programs(2) - 1)
    def _():
        y = acc_ref[...] + b_ref[...].astype(jnp.float32)
        if activation == "relu":
            y = jnp.maximum(y, 0.0)
        elif activation == "sigmoid":
            y = jax.nn.sigmoid(y)
        o_ref[...] = y.astype(o_ref.dtype)


def _linear_tiled_call(x_p, w_p, b_p, activation, out_dtype, tm,
                       budget, vmem_limit):
    Mp, Kp = x_p.shape
    _, Np = w_p.shape
    in_isz = x_p.dtype.itemsize
    w_isz = w_p.dtype.itemsize
    out_isz = jnp.dtype(out_dtype).itemsize

    # Large blocks (incl. 1024 candidates), shrunk against the VMEM budget.
    tn = _pick_tile(Np, (1024, 512, 256, 128))
    tk = _pick_tile(Kp, (1024, 512, 256, 128))

    def est(tk_, tn_):
        return (2 * tm * tk_ * in_isz          # LHS tiles (double-buffered)
                + 3 * tk_ * tn_ * w_isz        # weight tiles (up to 3 bufs)
                + 2 * tm * tn_ * out_isz       # output tiles
                + tm * tn_ * 4                 # f32 accumulator scratch
                + 2 * tn_ * w_isz)             # bias

    while est(tk, tn) > budget and (tk > 128 or tn > 128):
        if tk >= tn and tk > 128:
            tk //= 2
        else:
            tn //= 2

    # Tiny LHS -> the matmul per K step is too short to hide the weight DMA;
    # deepen the weight-tile pipeline.
    w_buffers = 3 if (tm <= 128 and (Kp // tk) >= 3) else 2

    kernel = functools.partial(_linear_tiled_kernel, activation=activation)
    return pl.pallas_call(
        kernel,
        out_shape=jax.ShapeDtypeStruct((Mp, Np), out_dtype),
        grid=(Mp // tm, Np // tn, Kp // tk),
        in_specs=[
            pl.BlockSpec((tm, tk), lambda i, j, k: (i, k)),
            _block_spec((tk, tn), lambda i, j, k: (k, j), buffers=w_buffers),
            pl.BlockSpec((1, tn), lambda i, j, k: (0, j)),
        ],
        out_specs=pl.BlockSpec((tm, tn), lambda i, j, k: (i, j)),
        scratch_shapes=[pltpu.VMEM((tm, tn), jnp.float32)],
        compiler_params=pltpu.CompilerParams(
            dimension_semantics=("parallel", "parallel", "arbitrary"),
            vmem_limit_bytes=int(vmem_limit)),
    )(x_p, w_p, b_p)


# ---------------------------------------------------------------------------
# Parameter init / one-time layout prep / forward
# ---------------------------------------------------------------------------
def init_mlp_params(key, input_dim, hidden_dim, output_dim, num_layers):
    """PyTorch nn.Linear-style params: weight (out, in), bias (out,)."""
    h = [hidden_dim] * (num_layers - 1)
    dims_in = [input_dim] + h
    dims_out = h + [output_dim]
    params = []
    for n_in, n_out in zip(dims_in, dims_out):
        key, kw, kb = jax.random.split(key, 3)
        bound = 1.0 / jnp.sqrt(jnp.float32(n_in))
        w = jax.random.uniform(kw, (n_out, n_in), jnp.float32, -bound, bound)
        b = jax.random.uniform(kb, (n_out,), jnp.float32, -bound, bound)
        params.append((w, b))
    return params


def prepare_params(params, dtype=None):
    """One-time layout prep (off the forward path): transpose PyTorch-style
    (out,in) weights to (in,out), zero-pad feature dims to lane multiples,
    optionally cast (dtype=jnp.bfloat16 recommended on v6e/v7x)."""
    prepared = []
    for (w, b) in params:
        n_out, n_in = w.shape
        wdt = w.dtype if dtype is None else dtype
        kp = _round_up(n_in, _LANE)
        np_ = _round_up(n_out, _LANE)
        wt = jnp.zeros((kp, np_), wdt).at[:n_in, :n_out].set(w.T.astype(wdt))
        bp = jnp.zeros((1, np_), wdt).at[0, :n_out].set(b.astype(wdt))
        prepared.append((wt, bp, n_out))
    return prepared


def mlp_forward(prepared_params, x, sigmoid_output=False, force_per_layer=False):
    M, K = x.shape
    compute_dtype = prepared_params[0][0].dtype
    K0p = prepared_params[0][0].shape[0]
    NLp = prepared_params[-1][0].shape[1]
    n_out_last = prepared_params[-1][2]
    num_layers = len(prepared_params)

    activations = (["relu"] * (num_layers - 1)
                   + ["sigmoid" if sigmoid_output else "none"])

    # ---- generation-aware VMEM budgets -----------------------------------
    capacity = _vmem_capacity_bytes()              # 128 MiB v5e/v6e, 64 MiB v7x
    fuse_budget = min((3 * capacity) // 4, 100 * _MIB)
    fuse_vmem_limit = min(capacity - 4 * _MIB, fuse_budget + 16 * _MIB)
    tiled_budget = min(capacity // 2, 48 * _MIB)
    tiled_vmem_limit = min(capacity - 4 * _MIB, tiled_budget + 16 * _MIB)

    Mp0 = _round_up(M, _SUBLANE)
    widest = max(w.shape[1] for (w, _, _) in prepared_params)
    itemsize = jnp.dtype(compute_dtype).itemsize

    # ---- fused-path batch tile: >=2 tiles when Mp>=16 (both v7x TCs get
    #      work); cap tm to keep the live f32 intermediate small on v5e. -----
    tm_cap = 256 if widest >= 1024 else 512
    n_tiles = 2 if Mp0 >= 16 else 1
    tm_fused = min(tm_cap, _round_up(_cdiv(Mp0, n_tiles), _SUBLANE))
    Mp_fused = _round_up(Mp0, tm_fused)

    weight_bytes = sum(w.size * w.dtype.itemsize + b.size * b.dtype.itemsize
                       for (w, b, _) in prepared_params)
    fused_est = (weight_bytes                             # single-buffered
                 + 2 * tm_fused * K0p * itemsize          # x (double buf)
                 + 2 * tm_fused * NLp * itemsize          # out (double buf)
                 + 2 * tm_fused * widest * 4)             # live f32 interm.

    use_fused = (not force_per_layer) and fused_est <= fuse_budget

    if use_fused:
        tm, Mp = tm_fused, Mp_fused
    else:
        # Whole padded batch as a single M tile whenever reasonable: each
        # weight matrix then streams from HBM exactly once per layer.
        tm = Mp0 if Mp0 <= 2048 else 512
        Mp = _round_up(M, tm)

    # ---- pad input once; skip the copy entirely when already aligned ------
    if Mp == M and K0p == K and x.dtype == compute_dtype:
        x_p = x
    else:
        x_p = jnp.zeros((Mp, K0p), compute_dtype)
        x_p = x_p.at[:M, :K].set(x.astype(compute_dtype))

    if use_fused:
        wb = [(w, b) for (w, b, _) in prepared_params]
        out_p = _fused_mlp_call(x_p, wb, activations, compute_dtype,
                                tm, fuse_vmem_limit)
    else:
        h = x_p
        for (w, b, _), act in zip(prepared_params, activations):
            h = _linear_tiled_call(h, w, b, act, compute_dtype, tm,
                                   tiled_budget, tiled_vmem_limit)
        out_p = h

    if Mp == M and NLp == n_out_last:
        return out_p
    return out_p[:M, :n_out_last]


def mlp_reference(params, x, sigmoid_output=False):
    num_layers = len(params)
    for i, (w, b) in enumerate(params):
        y = x @ w.T + b
        x = jnp.maximum(y, 0.0) if i < num_layers - 1 else y
    if sigmoid_output:
        x = jax.nn.sigmoid(x)
    return x


if __name__ == "__main__":
    key = jax.random.PRNGKey(0)

    # --- test 1: spec's toy shapes -> fused single-pallas_call path ---------
    batch, input_dim, hidden_dim, output_dim, num_layers = 8, 32, 32, 16, 3
    key, kx, kp = jax.random.split(key, 3)
    x = jax.random.normal(kx, (batch, input_dim), jnp.float32)
    params = init_mlp_params(kp, input_dim, hidden_dim, output_dim, num_layers)
    prepared = prepare_params(params)

    out = mlp_forward(prepared, x, sigmoid_output=True)
    out = jax.block_until_ready(out)
    ref = mlp_reference(params, x, sigmoid_output=True)
    assert out.shape == (batch, output_dim)
    assert jnp.allclose(out, ref, atol=1e-5, rtol=1e-5)

    # --- test 2: force the tiled per-layer path (K-reduction grid, pl.when
    #             init/epilogue, f32 accumulator, whole-batch M tile) --------
    batch2, in2, hid2, out2, layers2 = 24, 256, 192, 96, 3
    key, kx2, kp2 = jax.random.split(key, 3)
    x2 = jax.random.normal(kx2, (batch2, in2), jnp.float32)
    params2 = init_mlp_params(kp2, in2, hid2, out2, layers2)
    prepared2 = prepare_params(params2)

    o2 = mlp_forward(prepared2, x2, sigmoid_output=False, force_per_layer=True)
    o2 = jax.block_until_ready(o2)
    r2 = mlp_reference(params2, x2, sigmoid_output=False)
    assert o2.shape == (batch2, out2)
    assert jnp.allclose(o2, r2, atol=1e-4, rtol=1e-4)

    # --- test 3: bf16 weights/activations (recommended v6e/v7x config),
    #             fused path with a 2-tile batch grid ------------------------
    batch3, in3, hid3, out3, layers3 = 16, 64, 64, 32, 3
    key, kx3, kp3 = jax.random.split(key, 3)
    x3 = jax.random.normal(kx3, (batch3, in3), jnp.float32)
    params3 = init_mlp_params(kp3, in3, hid3, out3, layers3)
    prepared3 = prepare_params(params3, dtype=jnp.bfloat16)

    o3 = mlp_forward(prepared3, x3, sigmoid_output=True)
    o3 = jax.block_until_ready(o3)
    r3 = mlp_reference(params3, x3, sigmoid_output=True)
    assert o3.shape == (batch3, out3)
    assert jnp.allclose(o3.astype(jnp.float32), r3, atol=5e-2, rtol=5e-2)

    print("KERNEL_OK")
</pallas_src>

<mosaic_0001>
module attributes {stable_mosaic.version = 11 : i64} {
  func.func @_fused_mlp_kernel(%arg0: i32, %arg1: memref<8x128xf32, #tpu.memory_space<vmem>>, %arg2: memref<128x128xf32, #tpu.memory_space<vmem>>, %arg3: memref<1x128xf32, #tpu.memory_space<vmem>>, %arg4: memref<128x128xf32, #tpu.memory_space<vmem>>, %arg5: memref<1x128xf32, #tpu.memory_space<vmem>>, %arg6: memref<128x128xf32, #tpu.memory_space<vmem>>, %arg7: memref<1x128xf32, #tpu.memory_space<vmem>>, %arg8: memref<8x128xf32, #tpu.memory_space<vmem>>) attributes {dimension_semantics = [#tpu.dimension_semantics<parallel>], iteration_bounds = array<i64: 1>, scalar_prefetch = 0 : i64, scratch_operands = 0 : i64, tpu.core_type = #tpu.core_type<tc>, window_params = [{transform_indices = @transform_0, window_bounds = array<i64: 8, 128>}, {pipeline_mode = #tpu.pipeline_mode<synchronous>, transform_indices = @transform_1, window_bounds = array<i64: 128, 128>}, {pipeline_mode = #tpu.pipeline_mode<synchronous>, transform_indices = @transform_2, window_bounds = array<i64: 1, 128>}, {pipeline_mode = #tpu.pipeline_mode<synchronous>, transform_indices = @transform_3, window_bounds = array<i64: 128, 128>}, {pipeline_mode = #tpu.pipeline_mode<synchronous>, transform_indices = @transform_4, window_bounds = array<i64: 1, 128>}, {pipeline_mode = #tpu.pipeline_mode<synchronous>, transform_indices = @transform_5, window_bounds = array<i64: 128, 128>}, {pipeline_mode = #tpu.pipeline_mode<synchronous>, transform_indices = @transform_6, window_bounds = array<i64: 1, 128>}, {transform_indices = @transform_7, window_bounds = array<i64: 8, 128>}]} {
    %c0 = arith.constant 0 : index
    %c0_0 = arith.constant 0 : index
    %0 = vector.load %arg1[%c0, %c0_0] : memref<8x128xf32, #tpu.memory_space<vmem>>, vector<8x128xf32>
    %c0_1 = arith.constant 0 : index
    %c0_2 = arith.constant 0 : index
    %1 = vector.load %arg2[%c0_1, %c0_2] : memref<128x128xf32, #tpu.memory_space<vmem>>, vector<128x128xf32>
    %c0_3 = arith.constant 0 : index
    %c0_4 = arith.constant 0 : index
    %2 = vector.load %arg3[%c0_3, %c0_4] : memref<1x128xf32, #tpu.memory_space<vmem>>, vector<1x128xf32>
    %cst = arith.constant dense<0.000000e+00> : vector<8x128xf32>
    %3 = tpu.matmul %0, %1, %cst {dimension_numbers = #tpu.dot_dimension_numbers<[1], [0], [0], [1], [0, 0, 1, 1], [], []>} : vector<8x128xf32>, vector<128x128xf32>, vector<8x128xf32> -> vector<8x128xf32>
    %4 = vector.broadcast %2 : vector<1x128xf32> to vector<8x128xf32>
    %5 = arith.addf %3, %4 : vector<8x128xf32>
    %cst_5 = arith.constant 0.000000e+00 : f32
    %6 = vector.broadcast %cst_5 : f32 to vector<8x128xf32>
    %7 = arith.maximumf %5, %6 : vector<8x128xf32>
    %c0_6 = arith.constant 0 : index
    %c0_7 = arith.constant 0 : index
    %8 = vector.load %arg4[%c0_6, %c0_7] : memref<128x128xf32, #tpu.memory_space<vmem>>, vector<128x128xf32>
    %c0_8 = arith.constant 0 : index
    %c0_9 = arith.constant 0 : index
    %9 = vector.load %arg5[%c0_8, %c0_9] : memref<1x128xf32, #tpu.memory_space<vmem>>, vector<1x128xf32>
    %cst_10 = arith.constant dense<0.000000e+00> : vector<8x128xf32>
    %10 = tpu.matmul %7, %8, %cst_10 {dimension_numbers = #tpu.dot_dimension_numbers<[1], [0], [0], [1], [0, 0, 1, 1], [], []>} : vector<8x128xf32>, vector<128x128xf32>, vector<8x128xf32> -> vector<8x128xf32>
    %11 = vector.broadcast %9 : vector<1x128xf32> to vector<8x128xf32>
    %12 = arith.addf %10, %11 : vector<8x128xf32>
    %cst_11 = arith.constant 0.000000e+00 : f32
    %13 = vector.broadcast %cst_11 : f32 to vector<8x128xf32>
    %14 = arith.maximumf %12, %13 : vector<8x128xf32>
    %c0_12 = arith.constant 0 : index
    %c0_13 = arith.constant 0 : index
    %15 = vector.load %arg6[%c0_12, %c0_13] : memref<128x128xf32, #tpu.memory_space<vmem>>, vector<128x128xf32>
    %c0_14 = arith.constant 0 : index
    %c0_15 = arith.constant 0 : index
    %16 = vector.load %arg7[%c0_14, %c0_15] : memref<1x128xf32, #tpu.memory_space<vmem>>, vector<1x128xf32>
    %cst_16 = arith.constant dense<0.000000e+00> : vector<8x128xf32>
    %17 = tpu.matmul %14, %15, %cst_16 {dimension_numbers = #tpu.dot_dimension_numbers<[1], [0], [0], [1], [0, 0, 1, 1], [], []>} : vector<8x128xf32>, vector<128x128xf32>, vector<8x128xf32> -> vector<8x128xf32>
    %18 = vector.broadcast %16 : vector<1x128xf32> to vector<8x128xf32>
    %19 = arith.addf %17, %18 : vector<8x128xf32>
    %20 = arith.negf %19 : vector<8x128xf32>
    %21 = math.exp %20 : vector<8x128xf32>
    %cst_17 = arith.constant 1.000000e+00 : f32
    %22 = vector.broadcast %cst_17 : f32 to vector<8x128xf32>
    %23 = arith.addf %22, %21 : vector<8x128xf32>
    %24 = arith.divf %22, %23 : vector<8x128xf32>
    %c0_18 = arith.constant 0 : index
    %c0_19 = arith.constant 0 : index
    %25 = vector.load %arg8[%c0_18, %c0_19] : memref<8x128xf32, #tpu.memory_space<vmem>>, vector<8x128xf32>
    tpu.vector_store %arg8[%c0_18, %c0_19], %24 {strides = array<i32>} : memref<8x128xf32, #tpu.memory_space<vmem>>, vector<8x128xf32>,
    return
  }
  func.func @transform_0(%arg0: i32) -> (i32, i32) {
    %c0_i32 = arith.constant 0 : i32
    %c0_i32_0 = arith.constant 0 : i32
    return %arg0, %c0_i32 : i32, i32
  }
  func.func @transform_1(%arg0: i32) -> (i32, i32) {
    %c0_i32 = arith.constant 0 : i32
    %c0_i32_0 = arith.constant 0 : i32
    %c0_i32_1 = arith.constant 0 : i32
    return %c0_i32, %c0_i32_0 : i32, i32
  }
  func.func @transform_2(%arg0: i32) -> (i32, i32) {
    %c0_i32 = arith.constant 0 : i32
    %c0_i32_0 = arith.constant 0 : i32
    %c0_i32_1 = arith.constant 0 : i32
    return %c0_i32, %c0_i32_0 : i32, i32
  }
  func.func @transform_3(%arg0: i32) -> (i32, i32) {
    %c0_i32 = arith.constant 0 : i32
    %c0_i32_0 = arith.constant 0 : i32
    %c0_i32_1 = arith.constant 0 : i32
    return %c0_i32, %c0_i32_0 : i32, i32
  }
  func.func @transform_4(%arg0: i32) -> (i32, i32) {
    %c0_i32 = arith.constant 0 : i32
    %c0_i32_0 = arith.constant 0 : i32
    %c0_i32_1 = arith.constant 0 : i32
    return %c0_i32, %c0_i32_0 : i32, i32
  }
  func.func @transform_5(%arg0: i32) -> (i32, i32) {
    %c0_i32 = arith.constant 0 : i32
    %c0_i32_0 = arith.constant 0 : i32
    %c0_i32_1 = arith.constant 0 : i32
    return %c0_i32, %c0_i32_0 : i32, i32
  }
  func.func @transform_6(%arg0: i32) -> (i32, i32) {
    %c0_i32 = arith.constant 0 : i32
    %c0_i32_0 = arith.constant 0 : i32
    %c0_i32_1 = arith.constant 0 : i32
    return %c0_i32, %c0_i32_0 : i32, i32
  }
  func.func @transform_7(%arg0: i32) -> (i32, i32) {
    %c0_i32 = arith.constant 0 : i32
    %c0_i32_0 = arith.constant 0 : i32
    return %arg0, %c0_i32 : i32, i32
  }
}

</mosaic_0001>

<bundles_post_ra>
// kernel: tpu_custom_call.1
= control target key start
LH: loop header
LB: loop body
LE: loop exit
PB: predicated region body
PF: predicated region fallthrough
CT: control target
= control target key end

     0   :  { %12 = vsyncpa [#allocation3], 0  ;;  %s464_s0 = inlined_call_operand.hbm [shape: f32[8,128], index: 0, kind: input, shape index: {}]   ;;  %s465_s1 = inlined_call_operand.hbm [shape: f32[128,128], index: 1, kind: input, shape index: {}]   ;;  %s466_s2 = inlined_call_operand.vmem [shape: f32[1,128], index: 2, kind: input, shape index: {}]   ;;  %s467_s3 = inlined_call_operand.hbm [shape: f32[128,128], index: 3, kind: input, shape index: {}]   ;;  %s468_s4 = inlined_call_operand.vmem [shape: f32[1,128], index: 4, kind: input, shape index: {}]   ;;  %s469_s5 = inlined_call_operand.hbm [shape: f32[128,128], index: 5, kind: input, shape index: {}]   ;;  %s470_s6 = inlined_call_operand.vmem [shape: f32[1,128], index: 6, kind: input, shape index: {}]   ;;  %s471_s7 = inlined_call_operand.hbm [shape: f32[8,128], index: 7, kind: output, shape index: {}]  }
   0x1   :  { %13 = vsyncpa [#allocation6], 0 }
   0x2   :  { %14 = vsyncpa [#allocation9], 0  ;;  %s31_s26 = sshll.u32 %s465_s1, 4  ;;  %s32_s26 = int_to_ptr.hbm [resolvable:$true] %s31_s26 }
   0x3   :  { %15 = vsyncpa [#allocation4], 0  ;;  %s393_s27 = smov [#allocation5]   ;;  %s21_s8 = sshll.u32 %s464_s0, 4  ;;  %s22_s8 = int_to_ptr.hbm [resolvable:$true] %s21_s8 }
   0x4   :  { %s33_s28 = sshll.u32 %s393_s27, 4  ;;  %s394_s9 = smov 128   ;;  %s34_s28 = int_to_ptr.vmem [resolvable:$true] %s33_s28 }
   0x5   :  { %s395_s10 = smov 8   ;;  %s396_s11 = smov [#allocation2]  }
   0x6   :  { %39 = dma.hbm_to_vmem [thread:$0]  %s32_s26, 2048, %s34_s28, [#allocation6], %s394_s9, %s394_s9, %s395_s10  }
   0x7   :  { %s23_s12 = sshll.u32 %s396_s11, 4  ;;  %s46_s15 = sshll.u32 %s467_s3, 4  ;;  %s24_s12 = int_to_ptr.vmem [resolvable:$true] %s23_s12  ;;  %s47_s15 = int_to_ptr.hbm [resolvable:$true] %s46_s15 }
   0x8   :  { %26 = dma.hbm_to_vmem [thread:$0]  %s22_s8, 128, %s24_s12, [#allocation3]  }
   0x9   :  { %s61_s17 = sshll.u32 %s469_s5, 4  ;;  %s397_s18 = smov [#allocation7]   ;;  %s62_s17 = int_to_ptr.hbm [resolvable:$true] %s61_s17 }
   0xa   :  { %s48_s19 = sshll.u32 %s397_s18, 4  ;;  %s398_s0 = smov [#allocation8]   ;;  %s49_s19 = int_to_ptr.vmem [resolvable:$true] %s48_s19 }
   0xb   :  { %54 = dma.hbm_to_vmem [thread:$0]  %s47_s15, 2048, %s49_s19, [#allocation6], %s394_s9, %s394_s9, %s395_s10  }
   0xc   :  { %s63_s20 = sshll.u32 %s398_s0, 4  ;;  %s64_s20 = int_to_ptr.vmem [resolvable:$true] %s63_s20 }
   0xd   :  { %69 = dma.hbm_to_vmem [thread:$0]  %s62_s17, 2048, %s64_s20, [#allocation9], %s394_s9, %s394_s9, %s395_s10  }
   0xe   :  { %385 = dma.done.wait [#allocation3], 128  }
   0xf   :  { %386 = vsyncadd [#allocation3], 4294967168 }
  0x10   :  { %387 = dma.done.wait [#allocation6], 4096  }
  0x11   :  { %388 = vsyncadd [#allocation6], 4294963200 }
  0x12   :  { %389 = dma.done.wait [#allocation9], 2048  }
  0x13   :  { %390 = vsyncadd [#allocation9], 4294965248  ;;  %v104_v0 = vld [vmem:[#allocation5 + $0x78] sm:$0xff]  ;;  %v103_v1 = vld [vmem:[#allocation5 + $0x70] sm:$0xff] }
  0x14   :  { %109 = vmatpush.msra.mxu0 %v104_v0  ;;  %v102_v2 = vld [vmem:[#allocation5 + $0x68] sm:$0xff]  ;;  %v101_v3 = vld [vmem:[#allocation5 + $0x60] sm:$0xff]  ;;  %v145_v4 = vld [vmem:[#allocation7 + $0x78] sm:$0xff] }
  0x15   :  { %v100_v5 = vld [vmem:[#allocation5 + $0x58] sm:$0xff]  ;;  %150 = vmatpush.msra.mxu1 %v145_v4  ;;  %v144_v6 = vld [vmem:[#allocation7 + $0x70] sm:$0xff]  ;;  %v143_v7 = vld [vmem:[#allocation7 + $0x68] sm:$0xff] }
  0x16   :  { %110 = vmatpush.msra.mxu0 %v103_v1  ;;  %v99_v8 = vld [vmem:[#allocation5 + $0x50] sm:$0xff]  ;;  %v142_v9 = vld [vmem:[#allocation7 + $0x60] sm:$0xff]  ;;  %v98_v10 = vld [vmem:[#allocation5 + $0x48] sm:$0xff] }
  0x17   :  { %151 = vmatpush.msra.mxu1 %v144_v6  ;;  %v141_v11 = vld [vmem:[#allocation7 + $0x58] sm:$0xff]  ;;  %v97_v12 = vld [vmem:[#allocation5 + $0x40] sm:$0xff]  ;;  %v140_v13 = vld [vmem:[#allocation7 + $0x50] sm:$0xff] }
  0x18   :  { %111 = vmatpush.msra.mxu0 %v102_v2  ;;  %v96_v14 = vld [vmem:[#allocation5 + $0x38] sm:$0xff]  ;;  %v139_v15 = vld [vmem:[#allocation7 + $0x48] sm:$0xff]  ;;  %v95_v16 = vld [vmem:[#allocation5 + $0x30] sm:$0xff] }
  0x19   :  { %152 = vmatpush.msra.mxu1 %v143_v7  ;;  %v138_v17 = vld [vmem:[#allocation7 + $0x40] sm:$0xff]  ;;  %v94_v18 = vld [vmem:[#allocation5 + $0x28] sm:$0xff]  ;;  %v137_v19 = vld [vmem:[#allocation7 + $0x38] sm:$0xff] }
  0x1a   :  { %112 = vmatpush.msra.mxu0 %v101_v3  ;;  %v93_v20 = vld [vmem:[#allocation5 + $0x20] sm:$0xff]  ;;  %v136_v21 = vld [vmem:[#allocation7 + $0x30] sm:$0xff]  ;;  %v92_v22 = vld [vmem:[#allocation5 + $0x18] sm:$0xff] }
  0x1b   :  { %153 = vmatpush.msra.mxu1 %v142_v9  ;;  %v135_v23 = vld [vmem:[#allocation7 + $0x28] sm:$0xff]  ;;  %v91_v24 = vld [vmem:[#allocation5 + $0x10] sm:$0xff]  ;;  %v134_v25 = vld [vmem:[#allocation7 + $0x20] sm:$0xff] }
  0x1c   :  { %113 = vmatpush.msra.mxu0 %v100_v5  ;;  %v90_v26 = vld [vmem:[#allocation5 + $0x8] sm:$0xff]  ;;  %v133_v27 = vld [vmem:[#allocation7 + $0x18] sm:$0xff]  ;;  %v89_v28 = vld [vmem:[#allocation5] sm:$0xff] }
  0x1d   :  { %154 = vmatpush.msra.mxu1 %v141_v11  ;;  %v88_v29 = vld [vmem:[#allocation2] sm:$0xff]  ;;  %v132_v30 = vld [vmem:[#allocation7 + $0x10] sm:$0xff]  ;;  %v131_v31 = vld [vmem:[#allocation7 + $0x8] sm:$0xff] }
  0x1e   :  { %114 = vmatpush.msra.mxu0 %v99_v8  ;;  %v130_v32 = vld [vmem:[#allocation7] sm:$0xff]  ;;  %v186_v33 = vld [vmem:[#allocation8 + $0x78] sm:$0xff]  ;;  %v185_v34 = vld [vmem:[#allocation8 + $0x70] sm:$0xff] }
  0x1f   :  { %155 = vmatpush.msra.mxu1 %v140_v13  ;;  %191 = vmatpush.msra.mxu2 %v186_v33  ;;  %v184_v35 = vld [vmem:[#allocation8 + $0x68] sm:$0xff]  ;;  %v183_v36 = vld [vmem:[#allocation8 + $0x60] sm:$0xff]  ;;  %v182_v37 = vld [vmem:[#allocation8 + $0x58] sm:$0xff] }
  0x20   :  { %115 = vmatpush.msra.mxu0 %v98_v10  ;;  %v181_v38 = vld [vmem:[#allocation8 + $0x50] sm:$0xff]  ;;  %v180_v39 = vld [vmem:[#allocation8 + $0x48] sm:$0xff]  ;;  %v179_v40 = vld [vmem:[#allocation8 + $0x40] sm:$0xff] }
  0x21   :  { %156 = vmatpush.msra.mxu1 %v139_v15  ;;  %192 = vmatpush.msra.mxu2 %v185_v34  ;;  %v178_v41 = vld [vmem:[#allocation8 + $0x38] sm:$0xff]  ;;  %v177_v42 = vld [vmem:[#allocation8 + $0x30] sm:$0xff]  ;;  %v176_v43 = vld [vmem:[#allocation8 + $0x28] sm:$0xff] }
  0x22   :  { %116 = vmatpush.msra.mxu0 %v97_v12  ;;  %v175_v44 = vld [vmem:[#allocation8 + $0x20] sm:$0xff]  ;;  %v174_v45 = vld [vmem:[#allocation8 + $0x18] sm:$0xff]  ;;  %v173_v50 = vld [vmem:[#allocation8 + $0x10] sm:$0xff] }
  0x23   :  { %157 = vmatpush.msra.mxu1 %v138_v17  ;;  %193 = vmatpush.msra.mxu2 %v184_v35  ;;  %v258_v46 = vld [vmem:[%s466_s2] ss:$0 sm:$0xff]  ;;  %v172_v51 = vld [vmem:[#allocation8 + $0x8] sm:$0xff]  ;;  %v171_v52 = vld [vmem:[#allocation8] sm:$0xff] }
  0x24   :  { %117 = vmatpush.msra.mxu0 %v96_v14  ;;  %v259_v53 = vld [vmem:[%s468_s4] ss:$0 sm:$0xff]  ;;  %s399_s4 = smov [#allocation10]  }
  0x25   :  { %158 = vmatpush.msra.mxu1 %v137_v19  ;;  %194 = vmatpush.msra.mxu2 %v183_v36  ;;  %v260_v57 = vld [vmem:[%s470_s6] ss:$0 sm:$0xff]  ;;  %s236_s24 = sshll.u32 %s399_s4, 4  ;;  %s238_s6 = sshll.u32 %s471_s7, 4  ;;  %s237_s24 = int_to_ptr.vmem [resolvable:$true] %s236_s24  ;;  %s239_s6 = int_to_ptr.hbm [resolvable:$true] %s238_s6 }
  0x26   :  { %118 = vmatpush.msra.mxu0 %v95_v16 }
  0x27   :  { %159 = vmatpush.msra.mxu1 %v136_v21  ;;  %195 = vmatpush.msra.mxu2 %v182_v37 }
  0x28   :  { %119 = vmatpush.msra.mxu0 %v94_v18 }
  0x29   :  { %160 = vmatpush.msra.mxu1 %v135_v23  ;;  %196 = vmatpush.msra.mxu2 %v181_v38 }
  0x2a   :  { %120 = vmatpush.msra.mxu0 %v93_v20 }
  0x2b   :  { %161 = vmatpush.msra.mxu1 %v134_v25  ;;  %197 = vmatpush.msra.mxu2 %v180_v39 }
  0x2c   :  { %121 = vmatpush.msra.mxu0 %v92_v22 }
  0x2d   :  { %162 = vmatpush.msra.mxu1 %v133_v27  ;;  %198 = vmatpush.msra.mxu2 %v179_v40 }
  0x2e   :  { %122 = vmatpush.msra.mxu0 %v91_v24 }
  0x2f   :  { %163 = vmatpush.msra.mxu1 %v132_v30  ;;  %199 = vmatpush.msra.mxu2 %v178_v41 }
  0x30   :  { %123 = vmatpush.msra.mxu0 %v90_v26 }
  0x31   :  { %164 = vmatpush.msra.mxu1 %v131_v31  ;;  %200 = vmatpush.msra.mxu2 %v177_v42 }
  0x32   :  { %124 = vmatpush.msra.mxu0 %v89_v28 }
  0x33   :  { %125 = vmatmul.f32.vlgmr.msra.gmra.mxu0 %v88_v29  ;;  %165 = vmatpush.msra.mxu1 %v130_v32 }
  0x34   :  { %201 = vmatpush.msra.mxu2 %v176_v43 }
  0x36   :  { %202 = vmatpush.msra.mxu2 %v175_v44 }
  0x38   :  { %203 = vmatpush.msra.mxu2 %v174_v45 }
  0x3a   :  { %204 = vmatpush.msra.mxu2 %v173_v50 }
  0x3c   :  { %205 = vmatpush.msra.mxu2 %v172_v51 }
  0x3e   :  { %206 = vmatpush.msra.mxu2 %v171_v52 }
  0xb0   :  { %v126_v47 = vpop.f32.mrf.mxu0 }
  0xb1   :  { %v127_v48 = vadd.f32 %v258_v46, %v126_v47 }
  0xb3   :  { %v129_v49 = vmax.f32 %v127_v48, 0.0 }
  0xb5   :  { %166 = vmatmul.f32.vlgmr.msra.gmra.mxu1 %v129_v49 }
 0x132   :  { %v167_v54 = vpop.f32.mrf.mxu1 }
 0x133   :  { %v168_v55 = vadd.f32 %v259_v53, %v167_v54 }
 0x135   :  { %v170_v56 = vmax.f32 %v168_v55, 0.0 }
 0x137   :  { %207 = vmatmul.f32.vlgmr.msra.gmra.mxu2 %v170_v56 }
 0x1ba   :  { %v208_v58 = vpop.f32.mrf.mxu2 }
 0x1bb   :  { %v209_v59 = vadd.f32 %v260_v57, %v208_v58 }
 0x1bd   :  { %v250_v60 = vmul.f32 -1.442695, %v209_v59 }
 0x1bf   :  { %261 = vpow2.f32 %v250_v60 }
 0x1c5   :  { %v262_v61 = vpop.eup %261 }
 0x1c6   :  { %v214_v62 = vadd.f32 1.0, %v262_v61 }
 0x1c8   :  { %263 = vrcp.f32 %v214_v62  ;;  %v226_v2 = vand.u32 2147483648, %v214_v62  ;;  %v224_v4 = vand.u32 2147483647, %v214_v62  ;;  %vm220_vm1 = vweird.f32 %v214_v62 }
 0x1ca   :  { %v227_v6 = vor.u32 1.1754944e-38, %v226_v2  ;;  %vm225_vm3 = vcmp.eq.f32.partialorder %v224_v4, 8.507059e+37 }
 0x1ce   :  { %v264_v63 = vpop.eup %263 }
 0x1cf   :  { %v216_v0 = vmul.f32 %v264_v63, %v214_v62  ;;  %vm221_vm0 = vweird.f32 %v264_v63 }
 0x1d0   :  { %vm222_vm2 = vmor %vm220_vm1, %vm221_vm0 }
 0x1d1   :  { %v217_v1 = vsub.f32 1.0, %v216_v0 }
 0x1d3   :  { %v218_v3 = vmul.f32 %v264_v63, %v217_v1 }
 0x1d5   :  { %v219_v5 = vadd.f32 %v264_v63, %v218_v3 }
 0x1d7   :  { %v223_v7 = vsel %vm222_vm2, %v264_v63, %v219_v5 }
 0x1d8   :  { %v228_v8 = vsel %vm225_vm3, %v227_v6, %v223_v7 }
 0x1d9   :  { %230 = vst [vmem:[#allocation10] sm:$0xff] %v228_v8 }
 0x1da   :  { %241 = dma.vmem_to_hbm [thread:$0]  %s237_s24, 128, %s239_s6, [#allocation4]  }
 0x1db   :  { %391 = dma.done.wait [#allocation4], 128  }
 0x1dc   :  { %392 = vsyncadd [#allocation4], 4294967168 }
 0x1dd   :  { %246 = vsyncpa [#allocation3], 1 }
 0x1de   :  { %247 = vsyncpa [#allocation6], 1 }
 0x1df   :  { %248 = vsyncpa [#allocation9], 1 }
 0x1e0   :  { %249 = vsyncpa [#allocation4], 1 }

</bundles_post_ra>
